<compile_context>
chip_gen: v5e
topology: v5e:2x2
jax: 0.10.0
libtpu: 0.0.40
codegen_flags: <defaults>
</compile_context>

<pallas_src>
import jax
import jax.numpy as jnp
from jax import lax
from jax.experimental import pallas as pl
from jax.experimental.pallas import tpu as pltpu


def _round_up(x, m):
    return (x + m - 1) // m * m


def _chip_defaults():
    """(tile_m, tile_f, vmem_limit_bytes) tuned per TPU generation.

    Intensity of the weight stream is ~tile_m FLOPs/byte, so the compute-bound
    thresholds are roughly: v5e ~240, v7x ~310 (per TC), v6e ~650.
    """
    kind = ""
    try:
        kind = jax.devices()[0].device_kind.lower()
    except Exception:
        pass
    vmem_cap = None
    try:
        vmem_cap = int(pltpu.get_tpu_info().vmem_capacity_bytes)
    except Exception:
        pass

    is_v7 = ("v7" in kind) or ("7x" in kind) or (
        vmem_cap is not None and vmem_cap <= 64 * 1024 * 1024)
    if is_v7:
        cap = vmem_cap if vmem_cap else 64 * 1024 * 1024
        # 64 MiB VMEM per TC: keep tile_m high (intensity), shrink tile_f, and
        # leave ~8 MiB compiler-scratch headroom.
        return 512, 256, min(56 * 1024 * 1024, cap - 8 * 1024 * 1024)
    if "v5" in kind:
        cap = vmem_cap if vmem_cap else 128 * 1024 * 1024
        # 128-wide MXU, ~820 GB/s HBM: tile_m=256 is already compute-bound.
        return 256, 512, min(110 * 1024 * 1024, int(cap * 0.85))
    if "v6" in kind:
        cap = vmem_cap if vmem_cap else 128 * 1024 * 1024
        # Needs tile_m >~650 to be MXU-bound; 128 MiB VMEM has room.
        return 768, 512, min(110 * 1024 * 1024, int(cap * 0.85))
    # Unknown chip: conservative settings that fit every generation.
    cap = vmem_cap if vmem_cap else 64 * 1024 * 1024
    return 512, 256, min(56 * 1024 * 1024, int(cap * 0.85))


def _fit_tiles(tile_m, tile_f, Hp, c_isz, o_isz, vmem_limit):
    """Shrink tile_f (DMA granularity only), then tile_m (intensity lever),
    until the exact double-buffered working set fits the VMEM budget."""

    def working_set(tm, tf):
        return (2 * tm * Hp * c_isz            # x tile, double-buffered
                + 2 * 2 * tf * Hp * c_isz      # W1^T + W2 slabs, double-buffered
                + 2 * 8 * (tf + Hp) * 4        # biases (sublane-padded f32)
                + 2 * tm * Hp * o_isz          # output tile, double-buffered
                + tm * Hp * 4)                 # f32 accumulator scratch

    budget = int(vmem_limit * 0.9)
    while working_set(tile_m, tile_f) > budget and tile_f > 128:
        tile_f = max(128, (tile_f // 2) // 128 * 128)
    while working_set(tile_m, tile_f) > budget and tile_m > 16:
        tile_m = max(16, (tile_m // 2) // 16 * 16)
    return tile_m, tile_f


def prepare_ffn_params(w1, b1, w2, b2, compute_dtype=jnp.bfloat16):
    """One-time weight preparation (hoisted out of the per-call path).

    W1 (H, F) is stored transposed and padded as (Fp, Hp); W2 (F, H) is padded
    to (Fp, Hp). Both per-F-step slabs are then contiguous (tile_f, Hp) row
    blocks. Copies are skipped when shapes/dtypes already match.
    TODO(synk): int8 weight path with per-channel scales (2x MXU rate on
    v5e/v6e) not implemented.
    """
    H, F = w1.shape
    Hp, Fp = _round_up(H, 128), _round_up(F, 128)

    w1t = jnp.transpose(w1).astype(compute_dtype)   # (F, H)
    w2c = w2.astype(compute_dtype)                   # (F, H)
    if (Fp, Hp) != (F, H):
        w1t = jnp.zeros((Fp, Hp), compute_dtype).at[:F, :H].set(w1t)
        w2c = jnp.zeros((Fp, Hp), compute_dtype).at[:F, :H].set(w2c)

    b1p = b1.astype(jnp.float32)[None, :]
    b2p = b2.astype(jnp.float32)[None, :]
    if Fp != F:
        b1p = jnp.zeros((1, Fp), jnp.float32).at[:, :F].set(b1p)
    if Hp != H:
        b2p = jnp.zeros((1, Hp), jnp.float32).at[:, :H].set(b2p)

    return dict(w1t=w1t, b1=b1p, w2=w2c, b2=b2p,
                H=H, F=F, Hp=Hp, Fp=Fp, compute_dtype=compute_dtype)


def _ffn_kernel(x_ref, w1t_ref, b1_ref, w2_ref, b2_ref, o_ref, acc_ref):
    # x_ref   : (TM, Hp)  compute dtype
    # w1t_ref : (TF, Hp)  compute dtype  -- contiguous row slab of W1^T
    # b1_ref  : (1,  TF)  f32
    # w2_ref  : (TF, Hp)  compute dtype  -- contiguous row slab of W2
    # b2_ref  : (1,  Hp)  f32            -- resident
    # o_ref   : (TM, Hp)  output dtype
    # acc_ref : (TM, Hp)  f32 VMEM accumulator, resident across the F axis
    f = pl.program_id(1)

    # Layer 1 chunk on the MXU: x @ W1[:, f-slab]  ==  x · (W1^T slab)^T,
    # f32 accumulate; bias + ReLU in f32 on the VPU.
    h = lax.dot_general(
        x_ref[...], w1t_ref[...],
        dimension_numbers=(((1,), (1,)), ((), ())),
        preferred_element_type=jnp.float32)
    h = jnp.maximum(h + b1_ref[...], 0.0)
    # TODO(synk): training-mode dropout omitted — nn.Dropout is identity in eval.

    # Layer 2 partial product for this F chunk.
    partial = jnp.dot(h.astype(w2_ref.dtype), w2_ref[...],
                      preferred_element_type=jnp.float32)

    @pl.when(f == 0)
    def _():
        acc_ref[...] = partial          # init folded into first step (no zero pass)

    @pl.when(f > 0)
    def _():
        acc_ref[...] += partial

    @pl.when(f == pl.num_programs(1) - 1)
    def _():
        o_ref[...] = (acc_ref[...] + b2_ref[...]).astype(o_ref.dtype)


def ffn_pallas(x, params, *, tile_m=None, tile_f=None):
    """y = relu(x @ W1 + b1) @ W2 + b2, x: [B, S, H]; params from prepare_ffn_params."""
    B, S, H = x.shape
    assert H == params["H"], "hidden size mismatch with prepared params"
    Hp, Fp, F = params["Hp"], params["Fp"], params["F"]
    compute_dtype = params["compute_dtype"]
    out_dtype = x.dtype
    M = B * S

    dflt_tm, dflt_tf, vmem_limit = _chip_defaults()
    if tile_m is None:
        tile_m = dflt_tm
    if tile_f is None:
        tile_f = dflt_tf

    # bf16 packed-tile minimum is (16, 128): keep tile_m >= 16 and 16-aligned.
    tile_m = max(16, min(tile_m, _round_up(M, 16)))
    tile_m = _round_up(tile_m, 16)
    tile_f = max(128, min(tile_f, Fp))
    tile_f = (tile_f // 128) * 128

    c_isz = jnp.dtype(compute_dtype).itemsize
    o_isz = jnp.dtype(out_dtype).itemsize
    tile_m, tile_f = _fit_tiles(tile_m, tile_f, Hp, c_isz, o_isz, vmem_limit)
    # Weights were padded to Fp (multiple of 128) at prep time; keep tile_f a
    # divisor of Fp so no per-call re-padding is needed.
    while Fp % tile_f != 0:
        tile_f -= 128

    Mp = _round_up(M, tile_m)
    grid = (Mp // tile_m, Fp // tile_f)
    # TODO(synk): for single-M-tile (decode-like) shapes on v7x, an F-split
    # across the two TensorCores (CORE_PARALLEL + per-core partials) would
    # recover the idle core; not implemented here.

    # Per-call activation prep only (weights already prepared).
    x_flat = x.reshape(M, H)
    if (Mp, Hp) == (M, H):
        x2 = x_flat.astype(compute_dtype)
    else:
        x2 = jnp.zeros((Mp, Hp), compute_dtype).at[:M, :H].set(
            x_flat.astype(compute_dtype))

    num_m = Mp // tile_m
    flops = 4 * Mp * Hp * Fp  # two matmuls, 2*M*H*F each
    bytes_accessed = int(
        Mp * Hp * c_isz                         # activations in
        + num_m * 2 * Fp * Hp * c_isz           # W1^T + W2 streamed per M tile
        + (Fp + Hp) * 4                         # biases
        + Mp * Hp * o_isz)                      # output

    out2 = pl.pallas_call(
        _ffn_kernel,
        out_shape=jax.ShapeDtypeStruct((Mp, Hp), out_dtype),
        grid=grid,
        in_specs=[
            pl.BlockSpec((tile_m, Hp), lambda i, f: (i, 0)),   # x token tile
            pl.BlockSpec((tile_f, Hp), lambda i, f: (f, 0)),   # W1^T row slab
            pl.BlockSpec((1, tile_f),  lambda i, f: (0, f)),   # b1 slab
            pl.BlockSpec((tile_f, Hp), lambda i, f: (f, 0)),   # W2 row slab
            pl.BlockSpec((1, Hp),      lambda i, f: (0, 0)),   # b2 (resident)
        ],
        out_specs=pl.BlockSpec((tile_m, Hp), lambda i, f: (i, 0)),
        scratch_shapes=[pltpu.VMEM((tile_m, Hp), jnp.float32)],
        compiler_params=pltpu.CompilerParams(
            dimension_semantics=("parallel", "arbitrary"),
            vmem_limit_bytes=int(vmem_limit)),
        cost_estimate=pl.CostEstimate(flops=flops, transcendentals=0,
                                      bytes_accessed=bytes_accessed),
    )(x2, params["w1t"], params["b1"], params["w2"], params["b2"])

    return out2[:M, :H].reshape(B, S, H)


def _init_linear(key, in_size, out_size, dtype=jnp.float32):
    # Deterministic init mimicking nn.Linear's uniform(-1/sqrt(in), 1/sqrt(in)).
    kw, kb = jax.random.split(key)
    bound = 1.0 / (in_size ** 0.5)
    w = jax.random.uniform(kw, (in_size, out_size), dtype, -bound, bound)
    b = jax.random.uniform(kb, (out_size,), dtype, -bound, bound)
    return w, b


if __name__ == "__main__":
    # FFN config: hidden_size=32, ff_size=128, dropout_r=0.1 (identity in eval).
    B, S, H, F = 2, 8, 32, 128

    key = jax.random.PRNGKey(0)
    kx, k1, k2 = jax.random.split(key, 3)

    x = jax.random.normal(kx, (B, S, H), jnp.float32)
    w1, b1 = _init_linear(k1, H, F)   # Linear(hidden -> ff)
    w2, b2 = _init_linear(k2, F, H)   # Linear(ff -> hidden)

    # Weight prep happens once, outside the per-call path.
    params = prepare_ffn_params(w1, b1, w2, b2)

    out = ffn_pallas(x, params)
    jax.block_until_ready(out)

    # Reference with identical bf16-operand / f32-accumulate numerics.
    cd = jnp.bfloat16
    x2 = x.reshape(-1, H)
    h_ref = jnp.dot(x2.astype(cd), w1.astype(cd),
                    preferred_element_type=jnp.float32) + b1
    h_ref = jnp.maximum(h_ref, 0.0)
    ref = jnp.dot(h_ref.astype(cd), w2.astype(cd),
                  preferred_element_type=jnp.float32) + b2
    ref = ref.reshape(B, S, H)

    assert out.shape == (B, S, H)
    assert jnp.allclose(out, ref, atol=2e-3, rtol=2e-3), "mismatch vs reference"

    print("KERNEL_OK")
</pallas_src>

<mosaic_0001>
module attributes {stable_mosaic.version = 11 : i64} {
  func.func @_ffn_kernel(%arg0: i32, %arg1: i32, %arg2: memref<16x128xbf16, #tpu.memory_space<vmem>>, %arg3: memref<128x128xbf16, #tpu.memory_space<vmem>>, %arg4: memref<1x128xf32, #tpu.memory_space<vmem>>, %arg5: memref<128x128xbf16, #tpu.memory_space<vmem>>, %arg6: memref<1x128xf32, #tpu.memory_space<vmem>>, %arg7: memref<16x128xf32, #tpu.memory_space<vmem>>, %arg8: memref<16x128xf32, #tpu.memory_space<vmem>>) attributes {dimension_semantics = [#tpu.dimension_semantics<parallel>, #tpu.dimension_semantics<arbitrary>], iteration_bounds = array<i64: 1, 1>, scalar_prefetch = 0 : i64, scratch_operands = 1 : i64, tpu.core_type = #tpu.core_type<tc>, window_params = [{transform_indices = @transform_0, window_bounds = array<i64: 16, 128>}, {transform_indices = @transform_1, window_bounds = array<i64: 128, 128>}, {transform_indices = @transform_2, window_bounds = array<i64: 1, 128>}, {transform_indices = @transform_3, window_bounds = array<i64: 128, 128>}, {pipeline_mode = #tpu.pipeline_mode<synchronous>, transform_indices = @transform_4, window_bounds = array<i64: 1, 128>}, {transform_indices = @transform_5, window_bounds = array<i64: 16, 128>}]} {
    %c0 = arith.constant 0 : index
    %c0_0 = arith.constant 0 : index
    %0 = vector.load %arg2[%c0, %c0_0] : memref<16x128xbf16, #tpu.memory_space<vmem>>, vector<16x128xbf16>
    %c0_1 = arith.constant 0 : index
    %c0_2 = arith.constant 0 : index
    %1 = vector.load %arg3[%c0_1, %c0_2] : memref<128x128xbf16, #tpu.memory_space<vmem>>, vector<128x128xbf16>
    %cst = arith.constant dense<0.000000e+00> : vector<16x128xf32>
    %2 = tpu.matmul %0, %1, %cst {dimension_numbers = #tpu.dot_dimension_numbers<[1], [1], [0], [0], [0, 0, 1, 0], [], []>} : vector<16x128xbf16>, vector<128x128xbf16>, vector<16x128xf32> -> vector<16x128xf32>
    %c0_3 = arith.constant 0 : index
    %c0_4 = arith.constant 0 : index
    %3 = vector.load %arg4[%c0_3, %c0_4] : memref<1x128xf32, #tpu.memory_space<vmem>>, vector<1x128xf32>
    %4 = vector.broadcast %3 : vector<1x128xf32> to vector<16x128xf32>
    %5 = arith.addf %2, %4 : vector<16x128xf32>
    %cst_5 = arith.constant 0.000000e+00 : f32
    %6 = vector.broadcast %cst_5 : f32 to vector<16x128xf32>
    %7 = arith.maximumf %5, %6 : vector<16x128xf32>
    %8 = arith.truncf %7 : vector<16x128xf32> to vector<16x128xbf16>
    %c0_6 = arith.constant 0 : index
    %c0_7 = arith.constant 0 : index
    %9 = vector.load %arg5[%c0_6, %c0_7] : memref<128x128xbf16, #tpu.memory_space<vmem>>, vector<128x128xbf16>
    %cst_8 = arith.constant dense<0.000000e+00> : vector<16x128xf32>
    %10 = tpu.matmul %8, %9, %cst_8 {dimension_numbers = #tpu.dot_dimension_numbers<[1], [0], [0], [1], [0, 0, 1, 1], [], []>} : vector<16x128xbf16>, vector<128x128xbf16>, vector<16x128xf32> -> vector<16x128xf32>
    %c0_i32 = arith.constant 0 : i32
    %11 = arith.cmpi eq, %arg1, %c0_i32 : i32
    %12 = arith.extui %11 : i1 to i32
    %c0_i32_9 = arith.constant 0 : i32
    %13 = arith.cmpi ne, %12, %c0_i32_9 : i32
    scf.if %13 {
      %c0_14 = arith.constant 0 : index
      %c0_15 = arith.constant 0 : index
      %20 = vector.load %arg8[%c0_14, %c0_15] : memref<16x128xf32, #tpu.memory_space<vmem>>, vector<16x128xf32>
      tpu.vector_store %arg8[%c0_14, %c0_15], %10 {strides = array<i32>} : memref<16x128xf32, #tpu.memory_space<vmem>>, vector<16x128xf32>,
    } else {
    }
    %c0_i32_10 = arith.constant 0 : i32
    %14 = arith.cmpi sgt, %arg1, %c0_i32_10 : i32
    %15 = arith.extui %14 : i1 to i32
    %c0_i32_11 = arith.constant 0 : i32
    %16 = arith.cmpi ne, %15, %c0_i32_11 : i32
    scf.if %16 {
      %c0_14 = arith.constant 0 : index
      %c0_15 = arith.constant 0 : index
      %20 = vector.load %arg8[%c0_14, %c0_15] : memref<16x128xf32, #tpu.memory_space<vmem>>, vector<16x128xf32>
      %21 = arith.addf %20, %10 : vector<16x128xf32>
      %c0_16 = arith.constant 0 : index
      %c0_17 = arith.constant 0 : index
      %22 = vector.load %arg8[%c0_16, %c0_17] : memref<16x128xf32, #tpu.memory_space<vmem>>, vector<16x128xf32>
      tpu.vector_store %arg8[%c0_16, %c0_17], %21 {strides = array<i32>} : memref<16x128xf32, #tpu.memory_space<vmem>>, vector<16x128xf32>,
    } else {
    }
    %c0_i32_12 = arith.constant 0 : i32
    %17 = arith.cmpi eq, %arg1, %c0_i32_12 : i32
    %18 = arith.extui %17 : i1 to i32
    %c0_i32_13 = arith.constant 0 : i32
    %19 = arith.cmpi ne, %18, %c0_i32_13 : i32
    scf.if %19 {
      %c0_14 = arith.constant 0 : index
      %c0_15 = arith.constant 0 : index
      %20 = vector.load %arg8[%c0_14, %c0_15] : memref<16x128xf32, #tpu.memory_space<vmem>>, vector<16x128xf32>
      %c0_16 = arith.constant 0 : index
      %c0_17 = arith.constant 0 : index
      %21 = vector.load %arg6[%c0_16, %c0_17] : memref<1x128xf32, #tpu.memory_space<vmem>>, vector<1x128xf32>
      %22 = vector.broadcast %21 : vector<1x128xf32> to vector<16x128xf32>
      %23 = arith.addf %20, %22 : vector<16x128xf32>
      %c0_18 = arith.constant 0 : index
      %c0_19 = arith.constant 0 : index
      %24 = vector.load %arg7[%c0_18, %c0_19] : memref<16x128xf32, #tpu.memory_space<vmem>>, vector<16x128xf32>
      tpu.vector_store %arg7[%c0_18, %c0_19], %23 {strides = array<i32>} : memref<16x128xf32, #tpu.memory_space<vmem>>, vector<16x128xf32>,
    } else {
    }
    return
  }
  func.func @transform_0(%arg0: i32, %arg1: i32) -> (i32, i32) {
    %c0_i32 = arith.constant 0 : i32
    %c0_i32_0 = arith.constant 0 : i32
    return %arg0, %c0_i32 : i32, i32
  }
  func.func @transform_1(%arg0: i32, %arg1: i32) -> (i32, i32) {
    %c0_i32 = arith.constant 0 : i32
    %c0_i32_0 = arith.constant 0 : i32
    return %arg1, %c0_i32 : i32, i32
  }
  func.func @transform_2(%arg0: i32, %arg1: i32) -> (i32, i32) {
    %c0_i32 = arith.constant 0 : i32
    %c0_i32_0 = arith.constant 0 : i32
    return %c0_i32, %arg1 : i32, i32
  }
  func.func @transform_3(%arg0: i32, %arg1: i32) -> (i32, i32) {
    %c0_i32 = arith.constant 0 : i32
    %c0_i32_0 = arith.constant 0 : i32
    return %arg1, %c0_i32 : i32, i32
  }
  func.func @transform_4(%arg0: i32, %arg1: i32) -> (i32, i32) {
    %c0_i32 = arith.constant 0 : i32
    %c0_i32_0 = arith.constant 0 : i32
    %c0_i32_1 = arith.constant 0 : i32
    return %c0_i32, %c0_i32_0 : i32, i32
  }
  func.func @transform_5(%arg0: i32, %arg1: i32) -> (i32, i32) {
    %c0_i32 = arith.constant 0 : i32
    %c0_i32_0 = arith.constant 0 : i32
    return %arg0, %c0_i32 : i32, i32
  }
}

</mosaic_0001>

<bundles_post_ra>
// kernel: tpu_custom_call.1
= control target key start
LH: loop header
LB: loop body
LE: loop exit
PB: predicated region body
PF: predicated region fallthrough
CT: control target
= control target key end

     0   :  { %10 = vsyncpa [#allocation4], 0  ;;  %s541_s0 = inlined_call_operand.hbm [shape: bf16[16,128], index: 0, kind: input, shape index: {}]   ;;  %s542_s1 = inlined_call_operand.hbm [shape: bf16[128,128], index: 1, kind: input, shape index: {}]   ;;  %s543_s2 = inlined_call_operand.vmem [shape: f32[1,128], index: 2, kind: input, shape index: {}]   ;;  %s544_s3 = inlined_call_operand.hbm [shape: bf16[128,128], index: 3, kind: input, shape index: {}]   ;;  %s545_s4 = inlined_call_operand.vmem [shape: f32[1,128], index: 4, kind: input, shape index: {}]   ;;  %s546_s5 = inlined_call_operand.hbm [shape: f32[16,128], index: 5, kind: output, shape index: {}]  }
   0x1   :  { %11 = vsyncpa [#allocation7], 0 }
   0x2   :  { %12 = vsyncpa [#allocation5], 0  ;;  %s30_s20 = sshll.u32 %s542_s1, 4  ;;  %s485_s21 = smov [#allocation6]   ;;  %s31_s20 = int_to_ptr.hbm [resolvable:$true] %s30_s20 }
   0x3   :  { %s32_s22 = sshll.u32 %s485_s21, 4  ;;  %s17_s25 = sshll.u32 %s541_s0, 4  ;;  %s33_s22 = int_to_ptr.vmem [resolvable:$true] %s32_s22  ;;  %s18_s25 = int_to_ptr.hbm [resolvable:$true] %s17_s25 }
   0x4   :  { %s486_s26 = smov 64   ;;  %s487_s27 = smov 4  }
   0x5   :  { %38 = dma.hbm_to_vmem [thread:$0]  %s31_s20, 1024, %s33_s22, [#allocation7], %s486_s26, %s486_s26, %s487_s27  }
   0x6   :  { %s488_s28 = smov [#allocation3]   ;;  %s45_s7 = sshll.u32 %s544_s3, 4  ;;  %s46_s7 = int_to_ptr.hbm [resolvable:$true] %s45_s7 }
   0x7   :  { %s19_s29 = sshll.u32 %s488_s28, 4  ;;  %s489_s1 = smov [#allocation8]   ;;  %s20_s29 = int_to_ptr.vmem [resolvable:$true] %s19_s29 }
   0x8   :  { %25 = dma.hbm_to_vmem [thread:$0]  %s18_s25, 128, %s20_s29, [#allocation4], %s486_s26, %s486_s26, %s487_s27  }
   0x9   :  { %s47_s8 = sshll.u32 %s489_s1, 4  ;;  %s48_s8 = int_to_ptr.vmem [resolvable:$true] %s47_s8 }
   0xa   :  { %53 = dma.hbm_to_vmem [thread:$0]  %s46_s7, 1024, %s48_s8, [#allocation7], %s486_s26, %s486_s26, %s487_s27  }
   0xb   :  { %479 = dma.done.wait [#allocation4], 128  }
   0xc   :  { %480 = vsyncadd [#allocation4], 4294967168 }
   0xd   :  { %481 = dma.done.wait [#allocation7], 2048  }
   0xe   :  { %482 = vsyncadd [#allocation7], 4294965248  ;;  %v364_v0 = vld [vmem:[#allocation6 + $0x38] sm:$0xff]  ;;  %v363_v1 = vld [vmem:[#allocation6 + $0x30] sm:$0xff]  ;;  %s490_s11 = smov [#allocation9]   ;;  %s491_s15 = smov 128  }
   0xf   :  { %144 = vmatpush.bf16.xpose.msra.mxu0 %v364_v0  ;;  %v362_v2 = vld [vmem:[#allocation6 + $0x28] sm:$0xff]  ;;  %v361_v3 = vld [vmem:[#allocation6 + $0x20] sm:$0xff]  ;;  %v360_v4 = vld [vmem:[#allocation6 + $0x18] sm:$0xff]  ;;  %s272_s12 = sshll.u32 %s490_s11, 4  ;;  %s492_s16 = smov 8   ;;  %s273_s12 = int_to_ptr.vmem [resolvable:$true] %s272_s12 }
  0x10   :  { %v372_v5 = vld [vmem:[#allocation8 + $0x38] sm:$0xff]  ;;  %v371_v6 = vld [vmem:[#allocation8 + $0x30] sm:$0xff]  ;;  %v370_v8 = vld [vmem:[#allocation8 + $0x28] sm:$0xff] }
  0x11   :  { %225 = vmatpush.bf16.msra.mxu1 %v372_v5  ;;  %v359_v7 = vld [vmem:[#allocation6 + $0x10] sm:$0xff]  ;;  %v369_v9 = vld [vmem:[#allocation8 + $0x20] sm:$0xff]  ;;  %v358_v10 = vld [vmem:[#allocation6 + $0x8] sm:$0xff] }
  0x12   :  { %v357_v11 = vld [vmem:[#allocation6] sm:$0xff]  ;;  %v356_v12 = vld [vmem:[#allocation3] sm:$0xff]  ;;  %v367_v14 = vld [vmem:[#allocation8 + $0x10] sm:$0xff] }
  0x13   :  { %v368_v13 = vld [vmem:[#allocation8 + $0x18] sm:$0xff]  ;;  %v366_v15 = vld [vmem:[#allocation8 + $0x8] sm:$0xff]  ;;  %v365_v16 = vld [vmem:[#allocation8] sm:$0xff] }
  0x14   :  { %v381_v18 = vld [vmem:[%s543_s2] ss:$0 sm:$0xff]  ;;  %s274_s2 = sshll.u32 %s546_s5, 4  ;;  %s275_s2 = int_to_ptr.hbm [resolvable:$true] %s274_s2 }
  0x15   :  { %226 = vmatpush.bf16.msra.mxu1 %v371_v6  ;;  %v382_v25 = vld [vmem:[%s545_s4] ss:$0 sm:$0xff] }
  0x17   :  { %145 = vmatpush.bf16.xpose.msra.mxu0 %v363_v1 }
  0x19   :  { %227 = vmatpush.bf16.msra.mxu1 %v370_v8 }
  0x1d   :  { %228 = vmatpush.bf16.msra.mxu1 %v369_v9 }
  0x1f   :  { %146 = vmatpush.bf16.xpose.msra.mxu0 %v362_v2 }
  0x21   :  { %229 = vmatpush.bf16.msra.mxu1 %v368_v13 }
  0x25   :  { %230 = vmatpush.bf16.msra.mxu1 %v367_v14 }
  0x27   :  { %147 = vmatpush.bf16.xpose.msra.mxu0 %v361_v3 }
  0x29   :  { %231 = vmatpush.bf16.msra.mxu1 %v366_v15 }
  0x2d   :  { %232 = vmatpush.bf16.msra.mxu1 %v365_v16 }
  0x2f   :  { %148 = vmatpush.bf16.xpose.msra.mxu0 %v360_v4 }
  0x37   :  { %149 = vmatpush.bf16.xpose.msra.mxu0 %v359_v7 }
  0x3f   :  { %150 = vmatpush.bf16.xpose.msra.mxu0 %v358_v10 }
  0x47   :  { %151 = vmatpush.bf16.xpose.msra.mxu0 %v357_v11 }
  0x4e   :  { %152 = vmatmul.bf16.vlgmr.msra.gmra.mxu0 %v356_v12 }
  0xcb   :  { %v153_v17 = vpop.f32.mrf.mxu0 }
  0xcc   :  { %v154_v19 = vadd.f32 %v381_v18, %v153_v17 }
  0xce   :  { %v158_v22 = vmax.f32 %v154_v19, 0.0 }
  0xd3   :  { %v155_v20 = vpop.f32.mrf.mxu0 }
  0xd4   :  { %v156_v21 = vadd.f32 %v381_v18, %v155_v20 }
  0xd6   :  { %v159_v23 = vmax.f32 %v156_v21, 0.0 }
  0xd8   :  { %v160_v24 = vpack.c.bf16 %v159_v23, %v158_v22 }
  0xda   :  { %233 = vmatmul.bf16.vlgmr.msra.gmra.mxu1 %v160_v24 }
 0x157   :  { %v234_v26 = vpop.f32.mrf.mxu1 }
 0x158   :  { %v264_v27 = vadd.f32 %v382_v25, %v234_v26 }
 0x15a   :  { %266 = vst [vmem:[#allocation9] sm:$0xff] %v264_v27 }
 0x15f   :  { %v236_v28 = vpop.f32.mrf.mxu1 }
 0x160   :  { %v265_v29 = vadd.f32 %v382_v25, %v236_v28 }
 0x162   :  { %267 = vst [vmem:[#allocation9 + $0x8] sm:$0xff] %v265_v29 }
 0x163   :  { %280 = dma.vmem_to_hbm [thread:$0]  %s273_s12, 256, %s275_s2, [#allocation5], %s491_s15, %s491_s15, %s492_s16  }
 0x164   :  { %483 = dma.done.wait [#allocation5], 256  }
 0x165   :  { %484 = vsyncadd [#allocation5], 4294967040 }
 0x166   :  { %285 = vsyncpa [#allocation4], 1 }
 0x167   :  { %286 = vsyncpa [#allocation7], 1 }
 0x168   :  { %287 = vsyncpa [#allocation5], 1 }

</bundles_post_ra>
